<compile_context>
chip_gen: v7x
topology: tpu7x:2x2x1
jax: 0.10.0
libtpu: 0.0.40
codegen_flags: <defaults>
</compile_context>

<pallas_src>
import jax
import jax.numpy as jnp
from jax import lax
from jax.experimental import pallas as pl
from jax.experimental.pallas import tpu as pltpu


def _fused_kernel(x_ref, g_ref, w_ref, o_ref):
    # x_ref: (1, Cin, HW)      -- one batch element, NCHW with spatial flattened
    # g_ref: (1, Cin, 1)       -- per-batch, per-channel gate (pre-sigmoid)
    # w_ref: (Cout_blk, Cin)   -- 1x1 conv weight block (OIHW squeezed)
    # o_ref: (1, Cout_blk, HW) -- already NCHW-ordered output block
    gate = jax.nn.sigmoid(g_ref[0])            # (Cin, 1), EUP + VPU
    xs = x_ref[0] * gate                       # (Cin, HW), lane-broadcast mul
    out = lax.dot_general(                     # (Cout_blk, Cin) x (Cin, HW)
        w_ref[...], xs,
        dimension_numbers=(((1,), (0,)), ((), ())),
        preferred_element_type=jnp.float32,    # f32 accumulate on MXU
    )
    o_ref[0] = out.astype(o_ref.dtype)


def sigmoid_mul_conv1x1(x_nchw, gate_nchw, weight_oihw, *, cout_block=128):
    """x_nchw: (N, Cin, H, W); gate_nchw: (N, Cin, 1, 1);
    weight_oihw: (Cout, Cin, 1, 1).  Returns (N, Cout, H, W)."""
    N, Cin, H, W = x_nchw.shape
    Cout = weight_oihw.shape[0]
    HW = H * W

    # Pure reshapes only -- no transposes, no extra HBM round trips.
    x = x_nchw.reshape(N, Cin, HW)
    g = gate_nchw.reshape(N, Cin, 1)
    w = weight_oihw.reshape(Cout, Cin)

    # Split Cout into 128-wide blocks when it divides evenly (e.g. 384 = 3x128)
    # so the weight DMA can be sharded across TensorCores on v7x; otherwise
    # keep a single full-Cout block.
    if Cout > cout_block and Cout % cout_block == 0:
        cb = cout_block
    else:
        cb = Cout
    n_cout_blocks = Cout // cb

    out_flat = pl.pallas_call(
        _fused_kernel,
        out_shape=jax.ShapeDtypeStruct((N, Cout, HW), x.dtype),
        grid_spec=pltpu.PrefetchScalarGridSpec(
            num_scalar_prefetch=0,
            grid=(N, n_cout_blocks),
            in_specs=[
                # x / gate block index constant across the inner Cout axis ->
                # DMA'd once per batch element (consecutive-step DMA skip).
                pl.BlockSpec((1, Cin, HW), lambda b, j: (b, 0, 0)),
                pl.BlockSpec((1, Cin, 1), lambda b, j: (b, 0, 0)),
                pl.BlockSpec((cb, Cin), lambda b, j: (j, 0)),
            ],
            out_specs=pl.BlockSpec((1, cb, HW), lambda b, j: (b, j, 0)),
        ),
        compiler_params=pltpu.CompilerParams(
            dimension_semantics=("parallel", "parallel"),
        ),
    )(x, g, w)

    # Output is already NCHW-ordered; only a reshape is needed.
    return out_flat.reshape(N, Cout, H, W)


if __name__ == "__main__":
    # Small shapes consistent with the module (full size is N=1, Cin=2304,
    # Cout=384, H=W=7); scaled down but same structure.
    N, Cin, Cout, H, W = 2, 256, 128, 8, 8

    key = jax.random.PRNGKey(0)
    kx, kg, kw = jax.random.split(key, 3)
    x700 = jax.random.normal(kx, (N, Cin, H, W), dtype=jnp.float32)
    x704 = jax.random.normal(kg, (N, Cin, 1, 1), dtype=jnp.float32)
    # Deterministic conv weight (Conv2d(Cin, Cout, 1, bias=False)).
    weight = jax.random.normal(kw, (Cout, Cin, 1, 1), dtype=jnp.float32) * 0.02

    out = sigmoid_mul_conv1x1(x700, x704, weight)
    jax.block_until_ready(out)

    # Cross-check against a plain-JAX reference of the same math.
    ref = jnp.einsum(
        "nchw,oc->nohw",
        x700 * jax.nn.sigmoid(x704),
        weight.reshape(Cout, Cin),
    )
    assert out.shape == (N, Cout, H, W)
    assert jnp.allclose(out, ref, atol=1e-4, rtol=1e-4)

    print("KERNEL_OK")
</pallas_src>

<mosaic_0001>
module attributes {stable_mosaic.version = 11 : i64} {
  func.func @_fused_kernel(%arg0: i32, %arg1: i32, %arg2: memref<1x256x64xf32, #tpu.memory_space<vmem>>, %arg3: memref<1x256x1xf32, #tpu.memory_space<vmem>>, %arg4: memref<128x256xf32, #tpu.memory_space<vmem>>, %arg5: memref<1x128x64xf32, #tpu.memory_space<vmem>>) attributes {dimension_semantics = [#tpu.dimension_semantics<parallel>, #tpu.dimension_semantics<parallel>], iteration_bounds = array<i64: 2, 1>, scalar_prefetch = 0 : i64, scratch_operands = 0 : i64, tpu.core_type = #tpu.core_type<tc>, window_params = [{transform_indices = @transform_0, window_bounds = array<i64: 1, 256, 64>}, {transform_indices = @transform_1, window_bounds = array<i64: 1, 256, 1>}, {transform_indices = @transform_2, window_bounds = array<i64: 128, 256>}, {transform_indices = @transform_3, window_bounds = array<i64: 1, 128, 64>}]} {
    %c0 = arith.constant 0 : index
    %c0_0 = arith.constant 0 : index
    %c0_1 = arith.constant 0 : index
    %0 = vector.load %arg3[%c0, %c0_0, %c0_1] : memref<1x256x1xf32, #tpu.memory_space<vmem>>, vector<1x256x1xf32>
    %1 = vector.shape_cast %0 : vector<1x256x1xf32> to vector<256x1xf32>
    %2 = arith.negf %1 : vector<256x1xf32>
    %3 = math.exp %2 : vector<256x1xf32>
    %cst = arith.constant 1.000000e+00 : f32
    %4 = vector.broadcast %cst : f32 to vector<256x1xf32>
    %5 = arith.addf %4, %3 : vector<256x1xf32>
    %6 = arith.divf %4, %5 : vector<256x1xf32>
    %c0_2 = arith.constant 0 : index
    %c0_3 = arith.constant 0 : index
    %c0_4 = arith.constant 0 : index
    %7 = vector.load %arg2[%c0_2, %c0_3, %c0_4] : memref<1x256x64xf32, #tpu.memory_space<vmem>>, vector<1x256x64xf32>
    %8 = vector.shape_cast %7 : vector<1x256x64xf32> to vector<256x64xf32>
    %9 = vector.broadcast %6 : vector<256x1xf32> to vector<256x64xf32>
    %10 = arith.mulf %8, %9 : vector<256x64xf32>
    %c0_5 = arith.constant 0 : index
    %c0_6 = arith.constant 0 : index
    %11 = vector.load %arg4[%c0_5, %c0_6] : memref<128x256xf32, #tpu.memory_space<vmem>>, vector<128x256xf32>
    %cst_7 = arith.constant dense<0.000000e+00> : vector<128x64xf32>
    %12 = tpu.matmul %11, %10, %cst_7 {dimension_numbers = #tpu.dot_dimension_numbers<[1], [0], [0], [1], [0, 0, 1, 1], [], []>} : vector<128x256xf32>, vector<256x64xf32>, vector<128x64xf32> -> vector<128x64xf32>
    %c0_8 = arith.constant 0 : index
    %c0_9 = arith.constant 0 : index
    %c0_10 = arith.constant 0 : index
    %13 = vector.load %arg5[%c0_8, %c0_9, %c0_10] : memref<1x128x64xf32, #tpu.memory_space<vmem>>, vector<1x128x64xf32>
    %14 = vector.shape_cast %13 : vector<1x128x64xf32> to vector<128x64xf32>
    %15 = vector.shape_cast %12 : vector<128x64xf32> to vector<1x128x64xf32>
    tpu.vector_store %arg5[%c0_8, %c0_9, %c0_10], %15 {strides = array<i32>} : memref<1x128x64xf32, #tpu.memory_space<vmem>>, vector<1x128x64xf32>,
    return
  }
  func.func @transform_0(%arg0: i32, %arg1: i32) -> (i32, i32, i32) {
    %c0_i32 = arith.constant 0 : i32
    %c0_i32_0 = arith.constant 0 : i32
    %c0_i32_1 = arith.constant 0 : i32
    return %arg0, %c0_i32, %c0_i32_0 : i32, i32, i32
  }
  func.func @transform_1(%arg0: i32, %arg1: i32) -> (i32, i32, i32) {
    %c0_i32 = arith.constant 0 : i32
    %c0_i32_0 = arith.constant 0 : i32
    %c0_i32_1 = arith.constant 0 : i32
    return %arg0, %c0_i32, %c0_i32_0 : i32, i32, i32
  }
  func.func @transform_2(%arg0: i32, %arg1: i32) -> (i32, i32) {
    %c0_i32 = arith.constant 0 : i32
    %c0_i32_0 = arith.constant 0 : i32
    return %arg1, %c0_i32 : i32, i32
  }
  func.func @transform_3(%arg0: i32, %arg1: i32) -> (i32, i32, i32) {
    %c0_i32 = arith.constant 0 : i32
    %c0_i32_0 = arith.constant 0 : i32
    return %arg0, %arg1, %c0_i32 : i32, i32, i32
  }
}

</mosaic_0001>

<bundles_post_ra>
// kernel: tpu_custom_call.1
= control target key start
LH: loop header
LB: loop body
LE: loop exit
PB: predicated region body
PF: predicated region fallthrough
CT: control target
= control target key end

     0   :  { %s1366_s12 = smov 0   ;;  %s1368_s13 = smov 0   ;;  %s1608_s0 = inlined_call_operand.vmem [shape: f32[2,256,64], index: 0, kind: input, shape index: {}]   ;;  %s1609_s1 = inlined_call_operand.vmem [shape: f32[2,256,1], index: 1, kind: input, shape index: {}]   ;;  %s1610_s2 = inlined_call_operand.vmem [shape: f32[128,256], index: 2, kind: input, shape index: {}]   ;;  %s1611_s3 = inlined_call_operand.vmem [shape: f32[2,128,64], index: 3, kind: output, shape index: {}]  }
   0x1   :  { %s1370_s14 = smov 0  }
   0x2 LB: > { %s25_s15 = sadd.s32 1, %s1339_s13  ;;  %p994_p0 = scmp.ge.s32.totalorder %s1343_s14, 1  ;;  %s1343_s14 = sphi %s1370_s14, %s13_s14   ;;  %s1339_s13 = sphi %s1368_s13, %s1613_s13   ;;  %s1335_s12 = sphi %s1366_s12, %s1612_s12  }
   0x3   : > { %p27_p1 = scmp.ge.s32.totalorder %s25_s15, 2  ;;  %p173_p2 = scmp.lt.s32.totalorder %s1343_s14, 3 }
   0x5   : > { %s1615_s15 = smov (%p27_p1, %s25_s15), 0  ;;  %p174_p3 = pnand %p994_p0, %p173_p2 }
   0x6   : > { %p212_p4 = scmp.lt.s32.totalorder (!%p174_p3), %s1335_s12, 1  ;;  %v1345_v0 = vmov (!%p174_p3), 0   ;;  %vm864_vm0 = vcmask (!%p174_p3), 523264  }
   0x7   : > { %177 = sbr.rel (%p174_p3) target bundleno = 485 (0x1e5), region = 32  ;;  %1192 = vset.pattern.permute.xlu1 (!%p174_p3), %v1345_v0  ;;  %1191 = vset.pattern.permute.xlu0 (!%p174_p3), %v1345_v0 }
   0xe   : > { %s1617_s12 = smov (!%p212_p4, %s1335_s12), 1 }
   0xf   : > { %s1035_s16 = sshll.u32 %s1617_s12, 8  ;;  %s1037_s18 = sshll.u32 %s1617_s12, 7 }
  0x10   : > { %s1392_s19 = scalar_lea.vmem %s1609_s1, %s1035_s16  ;;  %s1437_s26 = scalar_lea.vmem %s1608_s0, %s1035_s16 }
  0x11   : > { %v255_v1 = vld [vmem:[%s1392_s19 + $0x80] sm:$0xff]  ;;  %v256_v3 = vld [vmem:[%s1392_s19 + $0x88] sm:$0xff]  ;;  %v257_v8 = vld [vmem:[%s1392_s19 + $0x90] sm:$0xff]  ;;  %s1565_s21 = scalar_lea.vmem %s1611_s3, %s1037_s18 }
  0x12   : > { %v239_v2 = vld [vmem:[%s1392_s19] sm:$0xff]  ;;  %v1017_v4 = vmul.f32 -1.442695, %v255_v1  ;;  %v1018_v6 = vmul.f32 -1.442695, %v256_v3  ;;  %v240_v7 = vld [vmem:[%s1392_s19 + $0x8] sm:$0xff] }
  0x13   : > { %v1001_v5 = vmul.f32 -1.442695, %v239_v2  ;;  %v258_v9 = vld [vmem:[%s1392_s19 + $0x98] sm:$0xff]  ;;  %v1002_v10 = vmul.f32 -1.442695, %v240_v7  ;;  %v241_v13 = vld [vmem:[%s1392_s19 + $0x10] sm:$0xff] }
  0x14   : > { %1193 = vpow2.f32 %v1017_v4  ;;  %v1019_v11 = vmul.f32 -1.442695, %v257_v8  ;;  %v1020_v12 = vmul.f32 -1.442695, %v258_v9  ;;  %v242_v14 = vld [vmem:[%s1392_s19 + $0x18] sm:$0xff]  ;;  %v259_v15 = vld [vmem:[%s1392_s19 + $0xa0] sm:$0xff] }
  0x15   : > { %1195 = vpow2.f32 %v1001_v5  ;;  %v1003_v16 = vmul.f32 -1.442695, %v241_v13  ;;  %v1004_v17 = vmul.f32 -1.442695, %v242_v14  ;;  %v260_v18 = vld [vmem:[%s1392_s19 + $0xa8] sm:$0xff]  ;;  %v243_v19 = vld [vmem:[%s1392_s19 + $0x20] sm:$0xff] }
  0x16   : > { %1197 = vpow2.f32 %v1018_v6  ;;  %v1021_v20 = vmul.f32 -1.442695, %v259_v15  ;;  %v244_v21 = vld [vmem:[%s1392_s19 + $0x28] sm:$0xff]  ;;  %v1022_v22 = vmul.f32 -1.442695, %v260_v18  ;;  %v261_v23 = vld [vmem:[%s1392_s19 + $0xb0] sm:$0xff] }
  0x17   : > { %1199 = vpow2.f32 %v1002_v10  ;;  %v1005_v24 = vmul.f32 -1.442695, %v243_v19  ;;  %v1006_v25 = vmul.f32 -1.442695, %v244_v21  ;;  %v1023_v26 = vmul.f32 -1.442695, %v261_v23 }
  0x18   : > { %1201 = vpow2.f32 %v1019_v11  ;;  %v262_v46 = vld [vmem:[%s1392_s19 + $0xb8] sm:$0xff]  ;;  %v245_v49 = vld [vmem:[%s1392_s19 + $0x30] sm:$0xff]  ;;  %v263_v56 = vld [vmem:[%s1392_s19 + $0xc0] sm:$0xff] }
  0x19   : > { %1203 = vpow2.f32 %v1020_v12  ;;  %v246_v52 = vld [vmem:[%s1392_s19 + $0x38] sm:$0xff]  ;;  %v1024_v55 = vmul.f32 -1.442695, %v262_v46  ;;  %v1007_v59 = vmul.f32 -1.442695, %v245_v49  ;;  %v264_v60 = vld [vmem:[%s1392_s19 + $0xc8] sm:$0xff] }
  0x1a   : > { %1205 = vpow2.f32 %v1003_v16  ;;  %v1008_v62 = vmul.f32 -1.442695, %v246_v52  ;;  %v247_v63 = vld [vmem:[%s1392_s19 + $0x40] sm:$0xff]  ;;  %v1025_v1 = vmul.f32 -1.442695, %v263_v56  ;;  %v248_v2 = vld [vmem:[%s1392_s19 + $0x48] sm:$0xff] }
  0x1b   : > { %1207 = vpow2.f32 %v1004_v17  ;;  %v1026_v4 = vmul.f32 -1.442695, %v264_v60  ;;  %v265_v5 = vld [vmem:[%s1392_s19 + $0xd0] sm:$0xff]  ;;  %v1009_v7 = vmul.f32 -1.442695, %v247_v63  ;;  %v266_v8 = vld [vmem:[%s1392_s19 + $0xd8] sm:$0xff] }
  0x1c   : > { %1209 = vpow2.f32 %v1021_v20  ;;  %v1010_v10 = vmul.f32 -1.442695, %v248_v2  ;;  %v249_v11 = vld [vmem:[%s1392_s19 + $0x50] sm:$0xff]  ;;  %v1027_v13 = vmul.f32 -1.442695, %v265_v5  ;;  %v250_v14 = vld [vmem:[%s1392_s19 + $0x58] sm:$0xff] }
  0x1d   : > { %1211 = vpow2.f32 %v1022_v22  ;;  %v1028_v16 = vmul.f32 -1.442695, %v266_v8  ;;  %v1011_v18 = vmul.f32 -1.442695, %v249_v11  ;;  %v1012_v20 = vmul.f32 -1.442695, %v250_v14 }
  0x1e   : > { %v1194_v27 = vpop.eup %1193  ;;  %1213 = vpow2.f32 %v1005_v24  ;;  %v267_v24 = vld [vmem:[%s1392_s19 + $0xe0] sm:$0xff]  ;;  %v269_v52 = vld [vmem:[%s1392_s19 + $0xf0] sm:$0xff]  ;;  %v254_v60 = vld [vmem:[%s1392_s19 + $0x78] sm:$0xff] }
  0x1f   : > { %v1196_v28 = vpop.eup %1195  ;;  %v383_v29 = vadd.f32 1.0, %v1194_v27  ;;  %1215 = vpow2.f32 %v1006_v25  ;;  %v1016_v2 = vmul.f32 -1.442695, %v254_v60 }
  0x20   : > { %v1198_v30 = vpop.eup %1197  ;;  %v367_v31 = vadd.f32 1.0, %v1196_v28  ;;  %1217 = vpow2.f32 %v1023_v26  ;;  %v268_v28 = vld [vmem:[%s1392_s19 + $0xe8] sm:$0xff] }
  0x21   : > { %v1200_v32 = vpop.eup %1199  ;;  %1219 = vrcp.f32 %v383_v29  ;;  %v384_v33 = vadd.f32 1.0, %v1198_v30 }
  0x22   : > { %v1202_v34 = vpop.eup %1201  ;;  %1221 = vrcp.f32 %v367_v31  ;;  %v368_v35 = vadd.f32 1.0, %v1200_v32  ;;  %v1029_v31 = vmul.f32 -1.442695, %v267_v24 }
  0x23   : > { %v1204_v36 = vpop.eup %1203  ;;  %1223 = vrcp.f32 %v384_v33  ;;  %v385_v37 = vadd.f32 1.0, %v1202_v34 }
  0x24   : > { %v1206_v38 = vpop.eup %1205  ;;  %1225 = vrcp.f32 %v368_v35  ;;  %v386_v39 = vadd.f32 1.0, %v1204_v36  ;;  %v1030_v36 = vmul.f32 -1.442695, %v268_v28 }
  0x25   : > { %v1208_v40 = vpop.eup %1207  ;;  %1227 = vrcp.f32 %v385_v37  ;;  %v369_v41 = vadd.f32 1.0, %v1206_v38 }
  0x26   : > { %v1210_v42 = vpop.eup %1209  ;;  %1229 = vrcp.f32 %v386_v39  ;;  %v370_v43 = vadd.f32 1.0, %v1208_v40 }
  0x27   : > { %v1212_v44 = vpop.eup %1211  ;;  %1231 = vrcp.f32 %v369_v41  ;;  %v387_v45 = vadd.f32 1.0, %v1210_v42 }
  0x28   : > { %v1214_v47 = vpop.eup %1213  ;;  %1233 = vrcp.f32 %v370_v43  ;;  %v388_v48 = vadd.f32 1.0, %v1212_v44 }
  0x29   : > { %v1216_v50 = vpop.eup %1215  ;;  %1235 = vrcp.f32 %v387_v45  ;;  %v371_v51 = vadd.f32 1.0, %v1214_v47  ;;  %v251_v47 = vld [vmem:[%s1392_s19 + $0x60] sm:$0xff] }
  0x2a   : > { %v1218_v53 = vpop.eup %1217  ;;  %1237 = vrcp.f32 %v388_v48  ;;  %v372_v54 = vadd.f32 1.0, %v1216_v50  ;;  %v252_v50 = vld [vmem:[%s1392_s19 + $0x68] sm:$0xff] }
  0x2b   : > { %v1220_v57 = vpop.eup %1219  ;;  %1239 = vrcp.f32 %v371_v51  ;;  %v389_v58 = vadd.f32 1.0, %v1218_v53  ;;  %v1013_v53 = vmul.f32 -1.442695, %v251_v47  ;;  %v1014_v56 = vmul.f32 -1.442695, %v252_v50  ;;  %v481_v47 = vld [vmem:[%s1437_s26 + $0x90] sm:$0xff] }
  0x2c   : > { %v1222_v61 = vpop.eup %1221  ;;  %577 = vperm.xlu0 %1191, %v1220_v57   ;;  %1241 = vrcp.f32 %v372_v54  ;;  %v270_v54 = vld [vmem:[%s1392_s19 + $0xf8] sm:$0xff]  ;;  %v253_v57 = vld [vmem:[%s1392_s19 + $0x70] sm:$0xff] }
  0x2d   : > { %v1224_v0 = vpop.eup %1223  ;;  %497 = vperm.xlu1 %1192, %v1222_v61   ;;  %1243 = vrcp.f32 %v389_v58 }
  0x2e   : > { %v1226_v3 = vpop.eup %1225  ;;  %1245 = vpow2.f32 %v1024_v55 }
  0x2f   : > { %v1228_v6 = vpop.eup %1227  ;;  %1247 = vpow2.f32 %v1007_v59  ;;  %v1031_v59 = vmul.f32 -1.442695, %v269_v52 }
  0x30   : > { %v1230_v9 = vpop.eup %1229  ;;  %582 = vperm.xlu0 %1191, %v1224_v0   ;;  %1249 = vpow2.f32 %v1008_v62  ;;  %v1032_v62 = vmul.f32 -1.442695, %v270_v54  ;;  %v1015_v0 = vmul.f32 -1.442695, %v253_v57 }
  0x31   : > { %v1232_v12 = vpop.eup %1231  ;;  %502 = vperm.xlu1 %1192, %v1226_v3   ;;  %1251 = vpow2.f32 %v1025_v1 }
  0x32   : > { %v1234_v15 = vpop.eup %1233  ;;  %1253 = vpow2.f32 %v1026_v4 }
  0x33   : > { %v1236_v17 = vpop.eup %1235  ;;  %1255 = vpow2.f32 %v1009_v7 }
  0x34   : > { %v1238_v19 = vpop.eup %1237  ;;  %587 = vperm.xlu0 %1191, %v1228_v6   ;;  %1257 = vpow2.f32 %v1010_v10 }
  0x35   : > { %v1240_v21 = vpop.eup %1239  ;;  %592 = vperm.xlu1 %1192, %v1230_v9   ;;  %1259 = vpow2.f32 %v1027_v13 }
  0x36   : > { %v1242_v22 = vpop.eup %1241  ;;  %1261 = vpow2.f32 %v1028_v16 }
  0x37   : > { %v1244_v23 = vpop.eup %1243  ;;  %1263 = vpow2.f32 %v1011_v18 }
  0x38   : > { %v1246_v25 = vpop.eup %1245  ;;  %507 = vperm.xlu0 %1191, %v1232_v12   ;;  %1265 = vpow2.f32 %v1012_v20 }
  0x39   : > { %v1248_v26 = vpop.eup %1247  ;;  %512 = vperm.xlu1 %1192, %v1234_v15   ;;  %v390_v27 = vadd.f32 1.0, %v1246_v25 }
  0x3a   : > { %v1250_v29 = vpop.eup %1249  ;;  %v373_v30 = vadd.f32 1.0, %v1248_v26 }
  0x3b   : > { %v1252_v32 = vpop.eup %1251  ;;  %1267 = vrcp.f32 %v390_v27  ;;  %v374_v33 = vadd.f32 1.0, %v1250_v29 }
  0x3c   : > { %v1254_v34 = vpop.eup %1253  ;;  %597 = vperm.xlu0 %1191, %v1236_v17   ;;  %1269 = vrcp.f32 %v373_v30  ;;  %v391_v35 = vadd.f32 1.0, %v1252_v32 }
  0x3d   : > { %v1256_v37 = vpop.eup %1255  ;;  %602 = vperm.xlu1 %1192, %v1238_v19   ;;  %1271 = vrcp.f32 %v374_v33  ;;  %v392_v38 = vadd.f32 1.0, %v1254_v34  ;;  %v688_v33 = vld [vmem:[%s1610_s2 + $0x8] sm:$0xff] }
  0x3e   : > { %v1258_v39 = vpop.eup %1257  ;;  %v375_v40 = vadd.f32 1.0, %v1256_v37  ;;  %1273 = vpow2.f32 %v1029_v31  ;;  %v704_v34 = vld [vmem:[%s1610_s2 + $0x88] sm:$0xff]  ;;  %783 = vmatprep.mubr.f32.mxu0 %v688_v33  ;;  %v479_v37 = vld [vmem:[%s1437_s26 + $0x80] sm:$0xff] }
  0x3f   : > { %v1260_v41 = vpop.eup %1259  ;;  %1275 = vrcp.f32 %v391_v35  ;;  %v376_v42 = vadd.f32 1.0, %v1258_v39  ;;  %823 = vmatprep.mubr.f32.mxu1 %v704_v34  ;;  %v463_v39 = vld [vmem:[%s1437_s26] sm:$0xff] }
  0x40   : > { %v1262_v43 = vpop.eup %1261  ;;  %517 = vperm.xlu0 %1191, %v1240_v21   ;;  %v393_v44 = vadd.f32 1.0, %v1260_v41  ;;  %1277 = vpow2.f32 %v1030_v36 }
  0x41   : > { %v1264_v45 = vpop.eup %1263  ;;  %522 = vperm.xlu1 %1192, %v1242_v22   ;;  %1279 = vrcp.f32 %v392_v38  ;;  %v394_v46 = vadd.f32 1.0, %v1262_v43  ;;  %v480_v38 = vld [vmem:[%s1437_s26 + $0x88] sm:$0xff] }
  0x42   : > { %v1266_v48 = vpop.eup %1265  ;;  %1281 = vrcp.f32 %v375_v40  ;;  %v377_v49 = vadd.f32 1.0, %v1264_v45  ;;  %v464_v40 = vld [vmem:[%s1437_s26 + $0x8] sm:$0xff] }
  0x43   : > { %1283 = vrcp.f32 %v376_v42  ;;  %v378_v51 = vadd.f32 1.0, %v1266_v48  ;;  %v482_v48 = vld [vmem:[%s1437_s26 + $0x98] sm:$0xff] }
  0x44   : > { %607 = vperm.xlu0 %1191, %v1244_v23   ;;  %1285 = vrcp.f32 %v393_v44 }
  0x45   : > { %v1268_v55 = vpop.eup %1267  ;;  %1287 = vrcp.f32 %v394_v46 }
  0x46   : > { %v1270_v58 = vpop.eup %1269  ;;  %612 = vperm.xlu1 %1192, %v1268_v55   ;;  %1289 = vrcp.f32 %v377_v49  ;;  %v465_v55 = vld [vmem:[%s1437_s26 + $0x10] sm:$0xff] }
  0x47   : > { %v1272_v61 = vpop.eup %1271  ;;  %1291 = vrcp.f32 %v378_v51 }
  0x48   : > { %v1274_v63 = vpop.eup %1273  ;;  %527 = vperm.xlu0 %1191, %v1270_v58   ;;  %1293 = vpow2.f32 %v1013_v53 }
  0x49   : > { %v1276_v1 = vpop.eup %1275  ;;  %1295 = vpow2.f32 %v1014_v56  ;;  %v395_v5 = vadd.f32 1.0, %v1274_v63  ;;  %v466_v56 = vld [vmem:[%s1437_s26 + $0x18] sm:$0xff]  ;;  %v484_v63 = vld [vmem:[%s1437_s26 + $0xa8] sm:$0xff] }
  0x4a   : > { %v1278_v3 = vpop.eup %1277  ;;  %532 = vperm.xlu1 %1192, %v1272_v61   ;;  %1297 = vpow2.f32 %v1031_v59 }
  0x4b   : > { %v1280_v4 = vpop.eup %1279  ;;  %1299 = vpow2.f32 %v1032_v62  ;;  %v396_v8 = vadd.f32 1.0, %v1278_v3  ;;  %v483_v62 = vld [vmem:[%s1437_s26 + $0xa0] sm:$0xff] }
  0x4c   : > { %v1282_v6 = vpop.eup %1281  ;;  %617 = vperm.xlu0 %1191, %v1276_v1   ;;  %1301 = vpow2.f32 %v1015_v0 }
  0x4d   : > { %v1284_v7 = vpop.eup %1283  ;;  %1303 = vpow2.f32 %v1016_v2 }
  0x4e   : > { %v1286_v9 = vpop.eup %1285  ;;  %622 = vperm.xlu1 %1192, %v1280_v4   ;;  %1305 = vrcp.f32 %v395_v5  ;;  %v467_v5 = vld [vmem:[%s1437_s26 + $0x20] sm:$0xff] }
  0x4f   : > { %v1288_v10 = vpop.eup %1287  ;;  %1307 = vrcp.f32 %v396_v8 }
  0x50   : > { %v1290_v11 = vpop.eup %1289  ;;  %537 = vperm.xlu0 %1191, %v1282_v6   ;;  %v468_v6 = vld [vmem:[%s1437_s26 + $0x28] sm:$0xff] }
  0x51   : > { %v1292_v12 = vpop.eup %1291 }
  0x52   : > { %v1294_v13 = vpop.eup %1293  ;;  %542 = vperm.xlu1 %1192, %v1284_v7  }
  0x53   : > { %v1296_v14 = vpop.eup %1295  ;;  %v379_v15 = vadd.f32 1.0, %v1294_v13 }
  0x54   : > { %v1298_v16 = vpop.eup %1297  ;;  %627 = vperm.xlu0 %1191, %v1286_v9   ;;  %v380_v17 = vadd.f32 1.0, %v1296_v14 }
  0x55   : > { %v1300_v18 = vpop.eup %1299  ;;  %1309 = vrcp.f32 %v379_v15  ;;  %v397_v19 = vadd.f32 1.0, %v1298_v16  ;;  %v486_v15 = vld [vmem:[%s1437_s26 + $0xb8] sm:$0xff] }
  0x56   : > { %v1302_v20 = vpop.eup %1301  ;;  %632 = vperm.xlu1 %1192, %v1288_v10   ;;  %1311 = vrcp.f32 %v380_v17  ;;  %v398_v21 = vadd.f32 1.0, %v1300_v18  ;;  %v469_v18 = vld [vmem:[%s1437_s26 + $0x30] sm:$0xff] }
  0x57   : > { %v1304_v22 = vpop.eup %1303  ;;  %1313 = vrcp.f32 %v397_v19  ;;  %v381_v23 = vadd.f32 1.0, %v1302_v20 }
  0x58   : > { %547 = vperm.xlu0 %1191, %v1290_v11   ;;  %v1306_v24 = vpop.eup %1305  ;;  %1315 = vrcp.f32 %v398_v21  ;;  %v382_v25 = vadd.f32 1.0, %v1304_v22  ;;  %v470_v21 = vld [vmem:[%s1437_s26 + $0x38] sm:$0xff] }
  0x59   : > { %v1308_v26 = vpop.eup %1307  ;;  %1317 = vrcp.f32 %v381_v23 }
  0x5a   : > { %552 = vperm.xlu1 %1192, %v1292_v12   ;;  %1319 = vrcp.f32 %v382_v25  ;;  %v485_v12 = vld [vmem:[%s1437_s26 + $0xb0] sm:$0xff]  ;;  %v487_v25 = vld [vmem:[%s1437_s26 + $0xc0] sm:$0xff] }
  0x5c   : > { %637 = vperm.xlu0 %1191, %v1306_v24  }
  0x5e   : > { %642 = vperm.xlu1 %1192, %v1308_v26  }
  0x5f   : > { %v1310_v27 = vpop.eup %1309 }
  0x60   : > { %v1312_v28 = vpop.eup %1311  ;;  %557 = vperm.xlu0 %1191, %v1310_v27  }
  0x61   : > { %v1314_v29 = vpop.eup %1313 }
  0x62   : > { %562 = vperm.xlu1 %1192, %v1312_v28   ;;  %v1316_v30 = vpop.eup %1315  ;;  %v488_v28 = vld [vmem:[%s1437_s26 + $0xc8] sm:$0xff] }
  0x63   : > { %v1318_v31 = vpop.eup %1317 }
  0x64   : > { %647 = vperm.xlu0 %1191, %v1314_v29   ;;  %v1320_v32 = vpop.eup %1319 }
  0x66   : > { %652 = vperm.xlu1 %1192, %v1316_v30  }
  0x68   : > { %567 = vperm.xlu0 %1191, %v1318_v31  }
  0x6a   : > { %572 = vperm.xlu1 %1192, %v1320_v32   ;;  %v471_v32 = vld [vmem:[%s1437_s26 + $0x40] sm:$0xff] }
  0xab   : > { %v578_v35 = vpop.permute.xlu0 %577 }
  0xac   : > { %v498_v36 = vpop.permute.xlu1 %497  ;;  %v671_v42 = vmul.f32 %v578_v35, %v479_v37  ;;  %v472_v35 = vld [vmem:[%s1437_s26 + $0x48] sm:$0xff] }
  0xad   : > { %v655_v45 = vmul.f32 %v498_v36, %v463_v39  ;;  %v489_v39 = vld [vmem:[%s1437_s26 + $0xd0] sm:$0xff] }
  0xaf   : > { %v583_v41 = vpop.permute.xlu0 %582 }
  0xb0   : > { %v672_v43 = vmul.f32 %v583_v41, %v480_v38  ;;  %v503_v44 = vpop.permute.xlu1 %502 }
  0xb1   : > { %v656_v46 = vmul.f32 %v503_v44, %v464_v40 }
  0xb2   : > { %v1118_v49 = vpack.c.bf16 %v672_v43, %v671_v42  ;;  %v490_v42 = vld [vmem:[%s1437_s26 + $0xd8] sm:$0xff] }
  0xb3   : > { %v588_v50 = vpop.permute.xlu0 %587  ;;  %v1120_v51 = vpack.c.bf16 %v656_v46, %v655_v45  ;;  %v473_v46 = vld [vmem:[%s1437_s26 + $0x50] sm:$0xff] }
  0xb4   : > { %v673_v52 = vmul.f32 %v588_v50, %v481_v47  ;;  %v593_v53 = vpop.permute.xlu1 %592  ;;  %1119 = vmatprep.subr.bf16.mxu0 %v1118_v49  ;;  %1150 = vmatprep.subr.bf16.mxu1 %v1118_v49  ;;  %v474_v49 = vld [vmem:[%s1437_s26 + $0x58] sm:$0xff] }
  0xb5   : > { %v674_v54 = vmul.f32 %v593_v53, %v482_v48  ;;  %1121 = vmatpush3.bf16.msra.mxu0 %v1120_v51  ;;  %1158 = vmatpush3.bf16.msra.mxu1 %v1120_v51  ;;  %v491_v53 = vld [vmem:[%s1437_s26 + $0xe0] sm:$0xff] }
  0xb7   : > { %v1122_v57 = vpack.c.bf16 %v674_v54, %v673_v52  ;;  %v508_v58 = vpop.permute.xlu0 %507 }
  0xb8   : > { %v657_v59 = vmul.f32 %v508_v58, %v465_v55  ;;  %v513_v60 = vpop.permute.xlu1 %512 }
  0xb9   : > { %v658_v61 = vmul.f32 %v513_v60, %v466_v56  ;;  %1123 = vmatprep.subr.bf16.mxu0 %v1122_v57  ;;  %1151 = vmatprep.subr.bf16.mxu1 %v1122_v57  ;;  %v492_v56 = vld [vmem:[%s1437_s26 + $0xe8] sm:$0xff]  ;;  %v475_v60 = vld [vmem:[%s1437_s26 + $0x60] sm:$0xff] }
  0xbb   : > { %v1124_v0 = vpack.c.bf16 %v658_v61, %v657_v59  ;;  %v598_v1 = vpop.permute.xlu0 %597 }
  0xbc   : > { %v675_v2 = vmul.f32 %v598_v1, %v483_v62  ;;  %v603_v3 = vpop.permute.xlu1 %602 }
  0xbd   : > { %v676_v4 = vmul.f32 %v603_v3, %v484_v63  ;;  %1125 = vmatpush3.bf16.msra.mxu0 %v1124_v0  ;;  %1159 = vmatpush3.bf16.msra.mxu1 %v1124_v0  ;;  %v476_v63 = vld [vmem:[%s1437_s26 + $0x68] sm:$0xff]  ;;  %v493_v3 = vld [vmem:[%s1437_s26 + $0xf0] sm:$0xff] }
  0xbf   : > { %v1126_v7 = vpack.c.bf16 %v676_v4, %v675_v2  ;;  %v518_v8 = vpop.permute.xlu0 %517 }
  0xc0   : > { %v659_v9 = vmul.f32 %v518_v8, %v467_v5  ;;  %v523_v10 = vpop.permute.xlu1 %522 }
  0xc1   : > { %v660_v11 = vmul.f32 %v523_v10, %v468_v6  ;;  %1127 = vmatprep.subr.bf16.mxu0 %v1126_v7  ;;  %1152 = vmatprep.subr.bf16.mxu1 %v1126_v7  ;;  %v494_v6 = vld [vmem:[%s1437_s26 + $0xf8] sm:$0xff]  ;;  %v477_v10 = vld [vmem:[%s1437_s26 + $0x70] sm:$0xff] }
  0xc3   : > { %v1128_v13 = vpack.c.bf16 %v660_v11, %v659_v9  ;;  %v608_v14 = vpop.permute.xlu0 %607 }
  0xc4   : > { %v677_v16 = vmul.f32 %v608_v14, %v485_v12 }
  0xc5   : > { %v613_v17 = vpop.permute.xlu1 %612  ;;  %1129 = vmatpush3.bf16.msra.mxu0 %v1128_v13  ;;  %1160 = vmatpush3.bf16.msra.mxu1 %v1128_v13  ;;  %v478_v13 = vld [vmem:[%s1437_s26 + $0x78] sm:$0xff] }
  0xc6   : > { %v678_v19 = vmul.f32 %v613_v17, %v486_v15 }
  0xc7   : > { %v528_v20 = vpop.permute.xlu0 %527 }
  0xc8   : > { %v1130_v22 = vpack.c.bf16 %v678_v19, %v677_v16  ;;  %v661_v23 = vmul.f32 %v528_v20, %v469_v18  ;;  %v687_v19 = vld [vmem:[%s1610_s2] sm:$0xff] }
  0xc9   : > { %v533_v24 = vpop.permute.xlu1 %532  ;;  %v703_v20 = vld [vmem:[%s1610_s2 + $0x80] sm:$0xff] }
  0xca   : > { %v662_v26 = vmul.f32 %v533_v24, %v470_v21  ;;  %1131 = vmatprep.subr.bf16.mxu0 %v1130_v22  ;;  %1153 = vmatprep.subr.bf16.mxu1 %v1130_v22  ;;  %v690_v21 = vld [vmem:[%s1610_s2 + $0x18] sm:$0xff]  ;;  %v705_v24 = vld [vmem:[%s1610_s2 + $0x90] sm:$0xff] }
  0xcb   : > { %v618_v27 = vpop.permute.xlu0 %617  ;;  %v706_v22 = vld [vmem:[%s1610_s2 + $0x98] sm:$0xff] }
  0xcc   : > { %v1132_v29 = vpack.c.bf16 %v662_v26, %v661_v23  ;;  %v679_v30 = vmul.f32 %v618_v27, %v487_v25  ;;  %v689_v23 = vld [vmem:[%s1610_s2 + $0x10] sm:$0xff]  ;;  %v692_v25 = vld [vmem:[%s1610_s2 + $0x28] sm:$0xff]  ;;  %v691_v27 = vld [vmem:[%s1610_s2 + $0x20] sm:$0xff] }
  0xcd   : > { %v623_v31 = vpop.permute.xlu1 %622  ;;  %v708_v26 = vld [vmem:[%s1610_s2 + $0xa8] sm:$0xff] }
  0xce   : > { %v680_v33 = vmul.f32 %v623_v31, %v488_v28  ;;  %1133 = vmatpush3.bf16.msra.mxu0 %v1132_v29  ;;  %1161 = vmatpush3.bf16.msra.mxu1 %v1132_v29  ;;  %v707_v28 = vld [vmem:[%s1610_s2 + $0xa0] sm:$0xff]  ;;  %v694_v29 = vld [vmem:[%s1610_s2 + $0x38] sm:$0xff]  ;;  %v693_v31 = vld [vmem:[%s1610_s2 + $0x30] sm:$0xff] }
  0xcf   : > { %v538_v34 = vpop.permute.xlu0 %537 }
  0xd0   : > { %v1134_v36 = vpack.c.bf16 %v680_v33, %v679_v30  ;;  %v663_v37 = vmul.f32 %v538_v34, %v471_v32  ;;  %v710_v30 = vld [vmem:[%s1610_s2 + $0xb8] sm:$0xff]  ;;  %v709_v32 = vld [vmem:[%s1610_s2 + $0xb0] sm:$0xff]  ;;  %v696_v33 = vld [vmem:[%s1610_s2 + $0x48] sm:$0xff] }
  0xd1   : > { %v543_v38 = vpop.permute.xlu1 %542  ;;  %v712_v34 = vld [vmem:[%s1610_s2 + $0xc8] sm:$0xff] }
  0xd2   : > { %v664_v40 = vmul.f32 %v543_v38, %v472_v35  ;;  %1135 = vmatprep.subr.bf16.mxu0 %v1134_v36  ;;  %1154 = vmatprep.subr.bf16.mxu1 %v1134_v36  ;;  %v695_v35 = vld [vmem:[%s1610_s2 + $0x40] sm:$0xff]  ;;  %v714_v38 = vld [vmem:[%s1610_s2 + $0xd8] sm:$0xff] }
  0xd3   : > { %v628_v41 = vpop.permute.xlu0 %627  ;;  %v711_v36 = vld [vmem:[%s1610_s2 + $0xc0] sm:$0xff] }
  0xd4   : > { %v1136_v43 = vpack.c.bf16 %v664_v40, %v663_v37  ;;  %v681_v44 = vmul.f32 %v628_v41, %v489_v39  ;;  %v698_v37 = vld [vmem:[%s1610_s2 + $0x58] sm:$0xff]  ;;  %v697_v39 = vld [vmem:[%s1610_s2 + $0x50] sm:$0xff]  ;;  %v700_v41 = vld [vmem:[%s1610_s2 + $0x68] sm:$0xff] }
  0xd5   : > { %v633_v45 = vpop.permute.xlu1 %632  ;;  %v713_v40 = vld [vmem:[%s1610_s2 + $0xd0] sm:$0xff] }
  0xd6   : > { %v682_v47 = vmul.f32 %v633_v45, %v490_v42  ;;  %1137 = vmatpush3.bf16.msra.mxu0 %v1136_v43  ;;  %1162 = vmatpush3.bf16.msra.mxu1 %v1136_v43  ;;  %v716_v42 = vld [vmem:[%s1610_s2 + $0xe8] sm:$0xff]  ;;  %v699_v43 = vld [vmem:[%s1610_s2 + $0x60] sm:$0xff]  ;;  %v702_v45 = vld [vmem:[%s1610_s2 + $0x78] sm:$0xff] }
  0xd7   : > { %v548_v48 = vpop.permute.xlu0 %547 }
  0xd8   : > { %v1138_v50 = vpack.c.bf16 %v682_v47, %v681_v44  ;;  %v665_v51 = vmul.f32 %v548_v48, %v473_v46  ;;  %v715_v44 = vld [vmem:[%s1610_s2 + $0xe0] sm:$0xff]  ;;  %v718_v46 = vld [vmem:[%s1610_s2 + $0xf8] sm:$0xff]  ;;  %v701_v47 = vld [vmem:[%s1610_s2 + $0x70] sm:$0xff] }
  0xd9   : > { %v553_v52 = vpop.permute.xlu1 %552  ;;  %v717_v48 = vld [vmem:[%s1610_s2 + $0xf0] sm:$0xff] }
  0xda   : > { %v666_v54 = vmul.f32 %v553_v52, %v474_v49  ;;  %1139 = vmatprep.subr.bf16.mxu0 %v1138_v50  ;;  %1155 = vmatprep.subr.bf16.mxu1 %v1138_v50 }
  0xdb   : > { %v638_v55 = vpop.permute.xlu0 %637 }
  0xdc   : > { %v1140_v57 = vpack.c.bf16 %v666_v54, %v665_v51  ;;  %v683_v58 = vmul.f32 %v638_v55, %v491_v53 }
  0xdd   : > { %v643_v59 = vpop.permute.xlu1 %642 }
  0xde   : > { %v684_v61 = vmul.f32 %v643_v59, %v492_v56  ;;  %1141 = vmatpush3.bf16.msra.mxu0 %v1140_v57  ;;  %1163 = vmatpush3.bf16.msra.mxu1 %v1140_v57 }
  0xdf   : > { %v558_v62 = vpop.permute.xlu0 %557 }
  0xe0   : > { %v1142_v0 = vpack.c.bf16 %v684_v61, %v683_v58  ;;  %v667_v1 = vmul.f32 %v558_v62, %v475_v60 }
  0xe1   : > { %v563_v2 = vpop.permute.xlu1 %562 }
  0xe2   : > { %v668_v4 = vmul.f32 %v563_v2, %v476_v63  ;;  %1143 = vmatprep.subr.bf16.mxu0 %v1142_v0  ;;  %1156 = vmatprep.subr.bf16.mxu1 %v1142_v0 }
  0xe3   : > { %v648_v5 = vpop.permute.xlu0 %647 }
  0xe4   : > { %v1144_v7 = vpack.c.bf16 %v668_v4, %v667_v1  ;;  %v685_v8 = vmul.f32 %v648_v5, %v493_v3 }
  0xe5   : > { %v653_v9 = vpop.permute.xlu1 %652 }
  0xe6   : > { %v686_v11 = vmul.f32 %v653_v9, %v494_v6  ;;  %1145 = vmatpush3.bf16.msra.mxu0 %v1144_v7  ;;  %1164 = vmatpush3.bf16.msra.mxu1 %v1144_v7 }
  0xe7   : > { %v568_v12 = vpop.permute.xlu0 %567 }
  0xe8   : > { %v1146_v14 = vpack.c.bf16 %v686_v11, %v685_v8  ;;  %v669_v15 = vmul.f32 %v568_v12, %v477_v10 }
  0xe9   : > { %v573_v16 = vpop.permute.xlu1 %572 }
  0xea   : > { %v670_v17 = vmul.f32 %v573_v16, %v478_v13  ;;  %1147 = vmatprep.subr.bf16.mxu0 %v1146_v14  ;;  %1157 = vmatprep.subr.bf16.mxu1 %v1146_v14 }
  0xec   : > { %v1148_v18 = vpack.c.bf16 %v670_v17, %v669_v15 }
  0xee   : > { %1149 = vmatpush3.bf16.msra.mxu0 %v1148_v18  ;;  %1165 = vmatpush3.bf16.msra.mxu1 %v1148_v18 }
  0xf1   : > { %784 = vmatmul.mubr.f32.vlgmr.msra.gmra.mrb[0].mxu0 %v687_v19  ;;  %824 = vmatmul.mubr.f32.vlgmr.msra.gmra.mrb[0].mxu1 %v703_v20 }
  0xf2   : > { %788 = vmatprep.mubr.f32.mxu0 %v690_v21  ;;  %828 = vmatprep.mubr.f32.mxu1 %v706_v22 }
  0xf5   : > { %789 = vmatmul.mubr.f32.gmra.mrb[2].mxu0 %v689_v23  ;;  %829 = vmatmul.mubr.f32.gmra.mrb[2].mxu1 %v705_v24 }
  0xf6   : > { %793 = vmatprep.mubr.f32.mxu0 %v692_v25  ;;  %833 = vmatprep.mubr.f32.mxu1 %v708_v26 }
  0xf9   : > { %794 = vmatmul.mubr.f32.gmra.mrb[4].mxu0 %v691_v27  ;;  %834 = vmatmul.mubr.f32.gmra.mrb[4].mxu1 %v707_v28 }
  0xfa   : > { %798 = vmatprep.mubr.f32.mxu0 %v694_v29  ;;  %838 = vmatprep.mubr.f32.mxu1 %v710_v30 }
  0xfd   : > { %799 = vmatmul.mubr.f32.gmra.mrb[6].mxu0 %v693_v31  ;;  %839 = vmatmul.mubr.f32.gmra.mrb[6].mxu1 %v709_v32 }
  0xfe   : > { %803 = vmatprep.mubr.f32.mxu0 %v696_v33  ;;  %843 = vmatprep.mubr.f32.mxu1 %v712_v34 }
 0x101   : > { %804 = vmatmul.mubr.f32.gmra.mrb[8].mxu0 %v695_v35  ;;  %844 = vmatmul.mubr.f32.gmra.mrb[8].mxu1 %v711_v36 }
 0x102   : > { %808 = vmatprep.mubr.f32.mxu0 %v698_v37  ;;  %848 = vmatprep.mubr.f32.mxu1 %v714_v38 }
 0x105   : > { %809 = vmatmul.mubr.f32.gmra.mrb[10].mxu0 %v697_v39  ;;  %849 = vmatmul.mubr.f32.gmra.mrb[10].mxu1 %v713_v40 }
 0x106   : > { %813 = vmatprep.mubr.f32.mxu0 %v700_v41  ;;  %853 = vmatprep.mubr.f32.mxu1 %v716_v42 }
 0x109   : > { %814 = vmatmul.mubr.f32.gmra.mrb[12].mxu0 %v699_v43  ;;  %854 = vmatmul.mubr.f32.gmra.mrb[12].mxu1 %v715_v44 }
 0x10a   : > { %818 = vmatprep.mubr.f32.mxu0 %v702_v45  ;;  %858 = vmatprep.mubr.f32.mxu1 %v718_v46 }
 0x10d   : > { %819 = vmatmul.mubr.f32.gmra.mrb[14].mxu0 %v701_v47  ;;  %859 = vmatmul.mubr.f32.gmra.mrb[14].mxu1 %v717_v48 }
 0x1c4   : > { %v1070_v49 = vpop.f32.mrb[0].mxu0  ;;  %v1094_v50 = vpop.f32.mrb[0].mxu1 }
 0x1c5   : > { %v1071_v51 = vpop.f32.mrb[1].mxu0  ;;  %v1095_v52 = vpop.f32.mrb[1].mxu1 }
 0x1c6   : > { %v1072_v53 = vadd.f32 %v1071_v51, %v1070_v49  ;;  %v1096_v54 = vadd.f32 %v1095_v52, %v1094_v50 }
 0x1c8   : > { %865 = vst.msk [vmem:[%s1565_s21] sm:$0xff] %vm864_vm0, %v1072_v53  ;;  %873 = vst.msk [vmem:[%s1565_s21 + $0x40] sm:$0xff] %vm864_vm0, %v1096_v54  ;;  %v1073_v55 = vpop.f32.mrb[2].mxu0  ;;  %v1097_v56 = vpop.f32.mrb[2].mxu1 }
 0x1c9   : > { %v1074_v57 = vpop.f32.mrb[3].mxu0  ;;  %v1098_v58 = vpop.f32.mrb[3].mxu1 }
 0x1ca   : > { %v1075_v59 = vadd.f32 %v1074_v57, %v1073_v55  ;;  %v1099_v60 = vadd.f32 %v1098_v58, %v1097_v56 }
 0x1cc   : > { %866 = vst.msk [vmem:[%s1565_s21 + $0x8] sm:$0xff] %vm864_vm0, %v1075_v59  ;;  %874 = vst.msk [vmem:[%s1565_s21 + $0x48] sm:$0xff] %vm864_vm0, %v1099_v60  ;;  %v1076_v61 = vpop.f32.mrb[4].mxu0  ;;  %v1100_v62 = vpop.f32.mrb[4].mxu1 }
 0x1cd   : > { %v1077_v63 = vpop.f32.mrb[5].mxu0  ;;  %v1101_v0 = vpop.f32.mrb[5].mxu1 }
 0x1ce   : > { %v1078_v1 = vadd.f32 %v1077_v63, %v1076_v61  ;;  %v1102_v2 = vadd.f32 %v1101_v0, %v1100_v62 }
 0x1d0   : > { %867 = vst.msk [vmem:[%s1565_s21 + $0x10] sm:$0xff] %vm864_vm0, %v1078_v1  ;;  %875 = vst.msk [vmem:[%s1565_s21 + $0x50] sm:$0xff] %vm864_vm0, %v1102_v2  ;;  %v1079_v3 = vpop.f32.mrb[6].mxu0  ;;  %v1103_v4 = vpop.f32.mrb[6].mxu1 }
 0x1d1   : > { %v1080_v5 = vpop.f32.mrb[7].mxu0  ;;  %v1104_v6 = vpop.f32.mrb[7].mxu1 }
 0x1d2   : > { %v1081_v7 = vadd.f32 %v1080_v5, %v1079_v3  ;;  %v1105_v8 = vadd.f32 %v1104_v6, %v1103_v4 }
 0x1d4   : > { %868 = vst.msk [vmem:[%s1565_s21 + $0x18] sm:$0xff] %vm864_vm0, %v1081_v7  ;;  %876 = vst.msk [vmem:[%s1565_s21 + $0x58] sm:$0xff] %vm864_vm0, %v1105_v8  ;;  %v1082_v9 = vpop.f32.mrb[8].mxu0  ;;  %v1106_v10 = vpop.f32.mrb[8].mxu1 }
 0x1d5   : > { %v1083_v11 = vpop.f32.mrb[9].mxu0  ;;  %v1107_v12 = vpop.f32.mrb[9].mxu1 }
 0x1d6   : > { %v1084_v13 = vadd.f32 %v1083_v11, %v1082_v9  ;;  %v1108_v14 = vadd.f32 %v1107_v12, %v1106_v10 }
 0x1d8   : > { %869 = vst.msk [vmem:[%s1565_s21 + $0x20] sm:$0xff] %vm864_vm0, %v1084_v13  ;;  %877 = vst.msk [vmem:[%s1565_s21 + $0x60] sm:$0xff] %vm864_vm0, %v1108_v14  ;;  %v1085_v15 = vpop.f32.mrb[10].mxu0  ;;  %v1109_v16 = vpop.f32.mrb[10].mxu1 }
 0x1d9   : > { %v1086_v17 = vpop.f32.mrb[11].mxu0  ;;  %v1110_v18 = vpop.f32.mrb[11].mxu1 }
 0x1da   : > { %v1087_v19 = vadd.f32 %v1086_v17, %v1085_v15  ;;  %v1111_v20 = vadd.f32 %v1110_v18, %v1109_v16 }
 0x1dc   : > { %870 = vst.msk [vmem:[%s1565_s21 + $0x28] sm:$0xff] %vm864_vm0, %v1087_v19  ;;  %878 = vst.msk [vmem:[%s1565_s21 + $0x68] sm:$0xff] %vm864_vm0, %v1111_v20  ;;  %v1088_v21 = vpop.f32.mrb[12].mxu0  ;;  %v1112_v22 = vpop.f32.mrb[12].mxu1 }
 0x1dd   : > { %v1089_v23 = vpop.f32.mrb[13].mxu0  ;;  %v1113_v24 = vpop.f32.mrb[13].mxu1 }
 0x1de   : > { %v1090_v25 = vadd.f32 %v1089_v23, %v1088_v21  ;;  %v1114_v26 = vadd.f32 %v1113_v24, %v1112_v22 }
 0x1e0   : > { %871 = vst.msk [vmem:[%s1565_s21 + $0x30] sm:$0xff] %vm864_vm0, %v1090_v25  ;;  %879 = vst.msk [vmem:[%s1565_s21 + $0x70] sm:$0xff] %vm864_vm0, %v1114_v26  ;;  %v1091_v27 = vpop.f32.mrb[14].mxu0  ;;  %v1115_v28 = vpop.f32.mrb[14].mxu1 }
 0x1e1   : > { %v1092_v29 = vpop.f32.mrb[15].mxu0  ;;  %v1116_v30 = vpop.f32.mrb[15].mxu1 }
 0x1e2   : > { %v1093_v31 = vadd.f32 %v1092_v29, %v1091_v27  ;;  %v1117_v32 = vadd.f32 %v1116_v30, %v1115_v28 }
 0x1e4   : > { %872 = vst.msk [vmem:[%s1565_s21 + $0x38] sm:$0xff] %vm864_vm0, %v1093_v31  ;;  %880 = vst.msk [vmem:[%s1565_s21 + $0x78] sm:$0xff] %vm864_vm0, %v1117_v32 }
 0x1e5 PF: > { %s13_s14 = sadd.s32 1, %s1343_s14   ;;  %s1612_s12 = smov %s1339_s13 }
 0x1e6   : > { %p10_p5 = scmp.ge.s32.totalorder %s13_s14, 4   ;;  %s1613_s13 = smov %s1615_s15 }
 0x1e8   :  { %12 = sbr.rel (!%p10_p5) target bundleno = 2 (0x2), region = 68 }

</bundles_post_ra>
